<compile_context>
chip_gen: v5e
topology: v5e:2x2
jax: 0.10.0
libtpu: 0.0.40
codegen_flags: <defaults>
</compile_context>

<pallas_src>
import jax
import jax.numpy as jnp
from jax import lax
from jax.experimental import pallas as pl
from jax.experimental.pallas import tpu as pltpu

RESOLUTION = 5.0
THERMAL_CONDUCTIVITY = 1.0
NORM_FACTOR = 1e-16
# specific_heat_water * temp_diff * volumetric_flow_rate / resolution**3
_HP_SCALE = 4200.0 * 5.0 * 0.00024 / RESOLUTION ** 3


# ----------------------------------------------------------------------------
# EOS helpers (pure elementwise math, shared by the kernel and the reference).
# TODO(synk): the bodies of eos_water_density_IFC67 / eos_water_enthalphy were
# not provided with the module; deterministic smooth analytic surrogates with
# realistic magnitudes (kg/m^3, mol/m^3, J/mol) are used instead.
# ----------------------------------------------------------------------------
def _eos_water_density_IFC67(T, p):
    T_k = T + 273.15
    density = 1000.0 * (1.0 - 3.0e-4 * (T_k - 277.0)) * (1.0 + 4.5e-10 * p)
    molar_density = density * (1.0 / 0.018015)
    return density, molar_density


def _eos_water_enthalpy(T, p):
    return 75.4 * (T + 273.15) + 1.8e-5 * p


def _round_up(x, m):
    return ((x + m - 1) // m) * m


_FALLBACK_PHYS_VMEM = 64 << 20   # conservative: v7x per-TensorCore VMEM


def _physical_vmem_bytes():
    try:
        info = pltpu.get_tpu_info()
        for attr in ("vmem_capacity_bytes", "vmem_size_bytes", "vmem_bytes"):
            v = getattr(info, attr, None)
            if v:
                return int(v)
    except Exception:
        pass
    return _FALLBACK_PHYS_VMEM


# ----------------------------------------------------------------------------
# Kernel factory: affine un-normalization constants, the 3x3 stencil taps and
# the true (unpadded) extents are baked in as compile-time constants.
# ----------------------------------------------------------------------------
def _make_kernel(nb, H, W, H_blk, W_blk,
                 p_s, p_o, vx_s, vx_o, vy_s, vy_o, t_s, t_o,
                 dt_scale, inv_res):
    f32 = jnp.float32

    def kernel(x_ref, t_ref, o_ref):
        # x_ref: (nb, 4, H_blk, W_blk) native dtype; t_ref: (nb, H_blk, W_blk).
        # Channel convention: 0 = Material ID (stays normalized), 1 = pressure,
        # 2 = x-velocity, 3 = y-velocity.
        shp = (H_blk, W_blk)

        # --- hoisted iotas / masks, shared by all shifts & gradients -------
        rowi = lax.broadcasted_iota(jnp.int32, shp, 0)
        coli = lax.broadcasted_iota(jnp.int32, shp, 1)
        first_h, last_h = rowi == 0, rowi == H - 1
        first_w, last_w = coli == 0, coli == W - 1
        up_h, dn_h = rowi < H - 1, rowi >= 1      # validity of x[i+1] / x[i-1]
        up_w, dn_w = coli < W - 1, coli >= 1
        valid = (rowi < H) & (coli < W)           # true-image region

        def shift(x, d, axis):
            # y[i] = x[i+d] with wrap-around (XLU roll; edges fixed by callers).
            return pltpu.roll(x, (-d) % x.shape[axis], axis)

        def zshift(x, d, axis, ok):
            # y[i] = x[i+d] if inside the true image else 0 (conv zero-padding).
            return jnp.where(ok, shift(x, d, axis), 0.0)

        def grad(x, axis, first, last):
            # numpy/torch.gradient, unit spacing, edge_order=1, true edges only.
            xp = shift(x, +1, axis)
            xm = shift(x, -1, axis)
            g = 0.5 * (xp - xm)
            g = jnp.where(first, xp - x, g)
            return jnp.where(last, x - xm, g)

        total = jnp.float32(0.0)
        for n in range(nb):                       # static unroll, nb small
            # In-kernel cast + reverse normalization (inputs stay native in HBM).
            T = t_ref[n].astype(f32) * t_s + t_o
            p = x_ref[n, 1].astype(f32) * p_s + p_o
            density, molar_density = _eos_water_density_IFC67(T, p)

            # Inflow stencil first so ids / density / hp die before flux slabs:
            # 3x3 kernel [[-1,0,1],[0,0,0],[1,0,-1]] with zero padding,
            # constant-folded + separable.
            hp = _HP_SCALE * density * x_ref[n, 0].astype(f32)
            a = zshift(hp, +1, 0, up_h) - zshift(hp, -1, 0, dn_h)
            inflow = zshift(a, -1, 1, dn_w) - zshift(a, +1, 1, up_w)

            me = molar_density * _eos_water_enthalpy(T, p)   # shared by both fluxes
            dT_h = grad(T, 0, first_h, last_h)
            dT_w = grad(T, 1, first_w, last_w)
            vx = x_ref[n, 2].astype(f32) * vx_s + vx_o
            vy = x_ref[n, 3].astype(f32) * vy_s + vy_o
            energy = (grad(me * vx - dT_h * dt_scale, 0, first_h, last_h)
                      + grad(me * vy - dT_w * dt_scale, 1, first_w, last_w)) * inv_res

            r = jnp.where(valid, energy - inflow, 0.0)
            total = total + jnp.sum(r * r)

        # Lane-dense partial-sum tile (unmasked vst).
        o_ref[...] = jnp.full((8, 128), total, jnp.float32)

    return kernel


def _build_energy_mse(norm):
    p_s, p_o = (float(v) for v in norm["pressure"])
    vx_s, vx_o = (float(v) for v in norm["vx"])
    vy_s, vy_o = (float(v) for v in norm["vy"])
    t_s, t_o = (float(v) for v in norm["temperature"])
    inv_res = 1.0 / RESOLUTION
    dt_scale = THERMAL_CONDUCTIVITY * inv_res

    phys_vmem = _physical_vmem_bytes()
    vmem_cap = (phys_vmem * 3) // 4          # generation-aware cap

    @jax.jit
    def fn(prediction, inputs):
        t = prediction
        if t.ndim == 3:                      # allow (B, H, W) predictions too
            t = t[:, None]
        B, C, H, W = inputs.shape
        assert C >= 4 and t.shape == (B, 1, H, W)
        assert H >= 2 and W >= 2

        # Hardware-aligned block extents; pad (with zeros, native dtype) only
        # when the image is not already (8,128)-aligned.
        H_blk = _round_up(H, 8)
        W_blk = _round_up(W, 128)
        if (H_blk, W_blk) != (H, W):
            pads = ((0, 0), (0, 0), (0, H_blk - H), (0, W_blk - W))
            x_in = jnp.pad(inputs[:, :4], pads)
            t_in = jnp.pad(t, pads)
        else:
            x_in, t_in = inputs, t           # channel block of 4 skips extras

        itemsize = max(jnp.dtype(x_in.dtype).itemsize, jnp.dtype(t_in.dtype).itemsize)
        per_img_in = 5 * H_blk * W_blk * itemsize        # 4 channels + prediction
        slab_f32 = H_blk * W_blk * 4

        def est_vmem(n_img):
            # double-buffered input/prediction blocks + ~live f32 temporaries/masks
            return 2 * n_img * per_img_in + 24 * slab_f32

        # Images per grid step: largest divisor of B (<=8) whose block stays
        # small (~2 MiB) and whose working set fits the VMEM cap.
        nb = 1
        for cand in range(min(B, 8), 0, -1):
            if B % cand:
                continue
            if est_vmem(cand) > vmem_cap:
                continue
            if cand > 1 and cand * per_img_in > (2 << 20):
                continue
            nb = cand
            break
        grid = (B // nb,)
        vmem_limit = int(min(vmem_cap, max(est_vmem(nb) * 3 // 2, 32 << 20)))

        kernel = _make_kernel(nb, H, W, H_blk, W_blk,
                              p_s, p_o, vx_s, vx_o, vy_s, vy_o, t_s, t_o,
                              dt_scale, inv_res)

        partials = pl.pallas_call(
            kernel,
            out_shape=jax.ShapeDtypeStruct((grid[0], 8, 128), jnp.float32),
            grid=grid,
            in_specs=[
                # nb images, only the 4 used channels, aligned H/W block.
                pl.BlockSpec((nb, 4, H_blk, W_blk), lambda g: (g, 0, 0, 0)),
                # Prediction: channel dim squeezed -> (nb, H_blk, W_blk) tile.
                pl.BlockSpec((nb, None, H_blk, W_blk), lambda g: (g, 0, 0, 0)),
            ],
            out_specs=pl.BlockSpec((None, 8, 128), lambda g: (g, 0, 0)),
            compiler_params=pltpu.CompilerParams(
                dimension_semantics=("parallel",),
                vmem_limit_bytes=vmem_limit,
            ),
        )(x_in, t_in)

        # Finish the MSE outside the kernel (grid-many tiny adds, true extents).
        return jnp.sum(partials[:, 0, 0]) / (B * H * W)

    return fn


# ----------------------------------------------------------------------------
# Module wrapper.
# ----------------------------------------------------------------------------
class EnergyLossPallas:
    # NCHW channel convention for `inputs`:
    #   0 = Material ID (stays normalized, as in the torch code)
    #   1 = Liquid Pressure [Pa], 2 = Liquid X-Velocity, 3 = Liquid Y-Velocity
    # `prediction` is (B, 1, H, W) normalized temperature.
    def __init__(self, keep_dim: bool = False):
        assert not keep_dim, "only keep_dim=False (scalar MSE) is implemented"
        # TODO(synk): NormalizeTransform/info.yaml not available; deterministic
        # affine reverse-normalization (x * scale + offset) stands in for it.
        self.norm = {
            "pressure": (1.0e5, 9.1e5),
            "vx": (1.0e-3, 0.0),
            "vy": (1.0e-2, 5.0e-3),
            "temperature": (5.0, 10.6),
        }
        # Kept for reference/inspection; the Pallas kernel bakes this fixed
        # stencil in as compile-time constants (only 4 non-zero +-1 taps).
        self.kernel = jnp.array(
            [[-1.0, 0.0, 1.0], [0.0, 0.0, 0.0], [1.0, 0.0, -1.0]], jnp.float32
        )
        self.norm_factor = NORM_FACTOR
        self._mse_fn = _build_energy_mse(self.norm)

    def __call__(self, prediction, inputs):
        return self._mse_fn(prediction, inputs) * self.norm_factor


# ----------------------------------------------------------------------------
# Pure-JAX reference (independent ops: jnp.gradient + lax.conv) for checking.
# ----------------------------------------------------------------------------
def _reference_loss(prediction, inputs, norm):
    x = inputs.astype(jnp.float32)
    ids = x[:, 0]
    p = x[:, 1] * norm["pressure"][0] + norm["pressure"][1]
    vx = x[:, 2] * norm["vx"][0] + norm["vx"][1]
    vy = x[:, 3] * norm["vy"][0] + norm["vy"][1]
    T = prediction.astype(jnp.float32)[:, 0] * norm["temperature"][0] + norm["temperature"][1]

    density, molar_density = _eos_water_density_IFC67(T, p)
    enthalpy = _eos_water_enthalpy(T, p)
    dT_h = jnp.gradient(T, axis=1)
    dT_w = jnp.gradient(T, axis=2)
    eu = jnp.gradient(
        molar_density * vx * enthalpy - THERMAL_CONDUCTIVITY * dT_h / RESOLUTION, axis=1
    ) / RESOLUTION
    ev = jnp.gradient(
        molar_density * vy * enthalpy - THERMAL_CONDUCTIVITY * dT_w / RESOLUTION, axis=2
    ) / RESOLUTION
    energy = eu + ev
    hp = _HP_SCALE * density * ids
    k2d = jnp.array([[-1.0, 0.0, 1.0], [0.0, 0.0, 0.0], [1.0, 0.0, -1.0]], jnp.float32)
    inflow = lax.conv_general_dilated(
        hp[:, None], k2d[None, None], (1, 1), ((1, 1), (1, 1)),
        dimension_numbers=("NCHW", "OIHW", "NCHW"),
    )[:, 0]
    energy = energy - inflow
    return jnp.mean(energy ** 2) * NORM_FACTOR


if __name__ == "__main__":
    B, C, H, W = 2, 4, 16, 16
    key = jax.random.PRNGKey(0)
    k1, k2 = jax.random.split(key)

    inputs = jax.random.normal(k1, (B, C, H, W), jnp.float32)
    # make the material-ID channel small & non-negative (normalized IDs)
    inputs = inputs.at[:, 0].set(jnp.abs(inputs[:, 0]) * 0.1)
    prediction = jax.random.normal(k2, (B, 1, H, W), jnp.float32)

    module = EnergyLossPallas()
    loss = jax.block_until_ready(module(prediction, inputs))

    # correctness check against the pure-JAX reference
    ref = jax.block_until_ready(_reference_loss(prediction, inputs, module.norm))
    assert jnp.isfinite(loss), "kernel produced non-finite loss"
    assert jnp.allclose(loss, ref, rtol=2e-3, atol=1e-12), (float(loss), float(ref))

    # exercise the native-dtype (bf16) path: no f32 cast / HBM round trip in
    # the wrapper; only check finiteness (bf16 input quantization shifts the MSE).
    loss_bf16 = jax.block_until_ready(
        module(prediction.astype(jnp.bfloat16), inputs.astype(jnp.bfloat16)))
    assert jnp.isfinite(loss_bf16), "bf16 path produced non-finite loss"

    print("KERNEL_OK")
</pallas_src>

<mosaic_0001>
module attributes {stable_mosaic.version = 11 : i64} {
  func.func @kernel(%arg0: i32, %arg1: memref<2x4x16x128xf32, #tpu.memory_space<vmem>>, %arg2: memref<2x1x16x128xf32, #tpu.memory_space<vmem>>, %arg3: memref<1x8x128xf32, #tpu.memory_space<vmem>>) attributes {dimension_semantics = [#tpu.dimension_semantics<parallel>], iteration_bounds = array<i64: 1>, scalar_prefetch = 0 : i64, scratch_operands = 0 : i64, tpu.core_type = #tpu.core_type<tc>, window_params = [{transform_indices = @transform_0, window_bounds = array<i64: 2, 4, 16, 128>}, {transform_indices = @transform_1, window_bounds = array<i64: 2, 1, 16, 128>}, {transform_indices = @transform_2, window_bounds = array<i64: 1, 8, 128>}]} {
    %0 = tpu.iota {dimensions = array<i32: 0>} : vector<16x128xi32>
    %1 = tpu.iota {dimensions = array<i32: 1>} : vector<16x128xi32>
    %c0_i32 = arith.constant 0 : i32
    %2 = vector.broadcast %c0_i32 : i32 to vector<16x128xi32>
    %3 = arith.cmpi eq, %0, %2 : vector<16x128xi32>
    %c15_i32 = arith.constant 15 : i32
    %4 = vector.broadcast %c15_i32 : i32 to vector<16x128xi32>
    %5 = arith.cmpi eq, %0, %4 : vector<16x128xi32>
    %c0_i32_0 = arith.constant 0 : i32
    %6 = vector.broadcast %c0_i32_0 : i32 to vector<16x128xi32>
    %7 = arith.cmpi eq, %1, %6 : vector<16x128xi32>
    %c15_i32_1 = arith.constant 15 : i32
    %8 = vector.broadcast %c15_i32_1 : i32 to vector<16x128xi32>
    %9 = arith.cmpi eq, %1, %8 : vector<16x128xi32>
    %c15_i32_2 = arith.constant 15 : i32
    %10 = vector.broadcast %c15_i32_2 : i32 to vector<16x128xi32>
    %11 = arith.cmpi slt, %0, %10 : vector<16x128xi32>
    %c1_i32 = arith.constant 1 : i32
    %12 = vector.broadcast %c1_i32 : i32 to vector<16x128xi32>
    %13 = arith.cmpi sge, %0, %12 : vector<16x128xi32>
    %c15_i32_3 = arith.constant 15 : i32
    %14 = vector.broadcast %c15_i32_3 : i32 to vector<16x128xi32>
    %15 = arith.cmpi slt, %1, %14 : vector<16x128xi32>
    %c1_i32_4 = arith.constant 1 : i32
    %16 = vector.broadcast %c1_i32_4 : i32 to vector<16x128xi32>
    %17 = arith.cmpi sge, %1, %16 : vector<16x128xi32>
    %c16_i32 = arith.constant 16 : i32
    %18 = vector.broadcast %c16_i32 : i32 to vector<16x128xi32>
    %19 = arith.cmpi slt, %0, %18 : vector<16x128xi32>
    %c16_i32_5 = arith.constant 16 : i32
    %20 = vector.broadcast %c16_i32_5 : i32 to vector<16x128xi32>
    %21 = arith.cmpi slt, %1, %20 : vector<16x128xi32>
    %22 = arith.andi %19, %21 : vector<16x128xi1>
    %c0 = arith.constant 0 : index
    %c0_6 = arith.constant 0 : index
    %c0_7 = arith.constant 0 : index
    %c0_8 = arith.constant 0 : index
    %23 = vector.load %arg2[%c0, %c0_6, %c0_7, %c0_8] : memref<2x1x16x128xf32, #tpu.memory_space<vmem>>, vector<1x1x16x128xf32>
    %24 = vector.shape_cast %23 : vector<1x1x16x128xf32> to vector<16x128xf32>
    %cst = arith.constant 5.000000e+00 : f32
    %25 = vector.broadcast %cst : f32 to vector<16x128xf32>
    %26 = arith.mulf %24, %25 : vector<16x128xf32>
    %cst_9 = arith.constant 1.060000e+01 : f32
    %27 = vector.broadcast %cst_9 : f32 to vector<16x128xf32>
    %28 = arith.addf %26, %27 : vector<16x128xf32>
    %c0_10 = arith.constant 0 : index
    %c1 = arith.constant 1 : index
    %c0_11 = arith.constant 0 : index
    %c0_12 = arith.constant 0 : index
    %29 = vector.load %arg1[%c0_10, %c1, %c0_11, %c0_12] : memref<2x4x16x128xf32, #tpu.memory_space<vmem>>, vector<1x1x16x128xf32>
    %30 = vector.shape_cast %29 : vector<1x1x16x128xf32> to vector<16x128xf32>
    %cst_13 = arith.constant 1.000000e+05 : f32
    %31 = vector.broadcast %cst_13 : f32 to vector<16x128xf32>
    %32 = arith.mulf %30, %31 : vector<16x128xf32>
    %cst_14 = arith.constant 9.100000e+05 : f32
    %33 = vector.broadcast %cst_14 : f32 to vector<16x128xf32>
    %34 = arith.addf %32, %33 : vector<16x128xf32>
    %cst_15 = arith.constant 2.731500e+02 : f32
    %35 = vector.broadcast %cst_15 : f32 to vector<16x128xf32>
    %36 = arith.addf %28, %35 : vector<16x128xf32>
    %cst_16 = arith.constant 2.770000e+02 : f32
    %37 = vector.broadcast %cst_16 : f32 to vector<16x128xf32>
    %38 = arith.subf %36, %37 : vector<16x128xf32>
    %cst_17 = arith.constant 3.000000e-04 : f32
    %39 = vector.broadcast %cst_17 : f32 to vector<16x128xf32>
    %40 = arith.mulf %39, %38 : vector<16x128xf32>
    %cst_18 = arith.constant 1.000000e+00 : f32
    %41 = vector.broadcast %cst_18 : f32 to vector<16x128xf32>
    %42 = arith.subf %41, %40 : vector<16x128xf32>
    %cst_19 = arith.constant 1.000000e+03 : f32
    %43 = vector.broadcast %cst_19 : f32 to vector<16x128xf32>
    %44 = arith.mulf %43, %42 : vector<16x128xf32>
    %cst_20 = arith.constant 4.500000e-10 : f32
    %45 = vector.broadcast %cst_20 : f32 to vector<16x128xf32>
    %46 = arith.mulf %45, %34 : vector<16x128xf32>
    %cst_21 = arith.constant 1.000000e+00 : f32
    %47 = vector.broadcast %cst_21 : f32 to vector<16x128xf32>
    %48 = arith.addf %47, %46 : vector<16x128xf32>
    %49 = arith.mulf %44, %48 : vector<16x128xf32>
    %cst_22 = arith.constant 55.5092964 : f32
    %50 = vector.broadcast %cst_22 : f32 to vector<16x128xf32>
    %51 = arith.mulf %49, %50 : vector<16x128xf32>
    %cst_23 = arith.constant 4.032000e-02 : f32
    %52 = vector.broadcast %cst_23 : f32 to vector<16x128xf32>
    %53 = arith.mulf %52, %49 : vector<16x128xf32>
    %c0_24 = arith.constant 0 : index
    %c0_25 = arith.constant 0 : index
    %c0_26 = arith.constant 0 : index
    %c0_27 = arith.constant 0 : index
    %54 = vector.load %arg1[%c0_24, %c0_25, %c0_26, %c0_27] : memref<2x4x16x128xf32, #tpu.memory_space<vmem>>, vector<1x1x16x128xf32>
    %55 = vector.shape_cast %54 : vector<1x1x16x128xf32> to vector<16x128xf32>
    %56 = arith.mulf %53, %55 : vector<16x128xf32>
    %c15_i32_28 = arith.constant 15 : i32
    %57 = tpu.dynamic_rotate %56 by %c15_i32_28 dim 0 : vector<16x128xf32>, i32 -> vector<16x128xf32>
    %cst_29 = arith.constant 0.000000e+00 : f32
    %58 = vector.broadcast %cst_29 : f32 to vector<16x128xf32>
    %59 = arith.select %11, %57, %58 : vector<16x128xi1>, vector<16x128xf32>
    %c1_i32_30 = arith.constant 1 : i32
    %60 = tpu.dynamic_rotate %56 by %c1_i32_30 dim 0 : vector<16x128xf32>, i32 -> vector<16x128xf32>
    %cst_31 = arith.constant 0.000000e+00 : f32
    %61 = vector.broadcast %cst_31 : f32 to vector<16x128xf32>
    %62 = arith.select %13, %60, %61 : vector<16x128xi1>, vector<16x128xf32>
    %63 = arith.subf %59, %62 : vector<16x128xf32>
    %c1_i32_32 = arith.constant 1 : i32
    %64 = tpu.dynamic_rotate %63 by %c1_i32_32 dim 1 : vector<16x128xf32>, i32 -> vector<16x128xf32>
    %cst_33 = arith.constant 0.000000e+00 : f32
    %65 = vector.broadcast %cst_33 : f32 to vector<16x128xf32>
    %66 = arith.select %17, %64, %65 : vector<16x128xi1>, vector<16x128xf32>
    %c127_i32 = arith.constant 127 : i32
    %67 = tpu.dynamic_rotate %63 by %c127_i32 dim 1 : vector<16x128xf32>, i32 -> vector<16x128xf32>
    %cst_34 = arith.constant 0.000000e+00 : f32
    %68 = vector.broadcast %cst_34 : f32 to vector<16x128xf32>
    %69 = arith.select %15, %67, %68 : vector<16x128xi1>, vector<16x128xf32>
    %70 = arith.subf %66, %69 : vector<16x128xf32>
    %cst_35 = arith.constant 2.731500e+02 : f32
    %71 = vector.broadcast %cst_35 : f32 to vector<16x128xf32>
    %72 = arith.addf %28, %71 : vector<16x128xf32>
    %cst_36 = arith.constant 7.540000e+01 : f32
    %73 = vector.broadcast %cst_36 : f32 to vector<16x128xf32>
    %74 = arith.mulf %73, %72 : vector<16x128xf32>
    %cst_37 = arith.constant 1.800000e-05 : f32
    %75 = vector.broadcast %cst_37 : f32 to vector<16x128xf32>
    %76 = arith.mulf %75, %34 : vector<16x128xf32>
    %77 = arith.addf %74, %76 : vector<16x128xf32>
    %78 = arith.mulf %51, %77 : vector<16x128xf32>
    %c15_i32_38 = arith.constant 15 : i32
    %79 = tpu.dynamic_rotate %28 by %c15_i32_38 dim 0 : vector<16x128xf32>, i32 -> vector<16x128xf32>
    %c1_i32_39 = arith.constant 1 : i32
    %80 = tpu.dynamic_rotate %28 by %c1_i32_39 dim 0 : vector<16x128xf32>, i32 -> vector<16x128xf32>
    %81 = arith.subf %79, %80 : vector<16x128xf32>
    %cst_40 = arith.constant 5.000000e-01 : f32
    %82 = vector.broadcast %cst_40 : f32 to vector<16x128xf32>
    %83 = arith.mulf %82, %81 : vector<16x128xf32>
    %84 = arith.subf %79, %28 : vector<16x128xf32>
    %85 = arith.select %3, %84, %83 : vector<16x128xi1>, vector<16x128xf32>
    %86 = arith.subf %28, %80 : vector<16x128xf32>
    %87 = arith.select %5, %86, %85 : vector<16x128xi1>, vector<16x128xf32>
    %c127_i32_41 = arith.constant 127 : i32
    %88 = tpu.dynamic_rotate %28 by %c127_i32_41 dim 1 : vector<16x128xf32>, i32 -> vector<16x128xf32>
    %c1_i32_42 = arith.constant 1 : i32
    %89 = tpu.dynamic_rotate %28 by %c1_i32_42 dim 1 : vector<16x128xf32>, i32 -> vector<16x128xf32>
    %90 = arith.subf %88, %89 : vector<16x128xf32>
    %cst_43 = arith.constant 5.000000e-01 : f32
    %91 = vector.broadcast %cst_43 : f32 to vector<16x128xf32>
    %92 = arith.mulf %91, %90 : vector<16x128xf32>
    %93 = arith.subf %88, %28 : vector<16x128xf32>
    %94 = arith.select %7, %93, %92 : vector<16x128xi1>, vector<16x128xf32>
    %95 = arith.subf %28, %89 : vector<16x128xf32>
    %96 = arith.select %9, %95, %94 : vector<16x128xi1>, vector<16x128xf32>
    %c0_44 = arith.constant 0 : index
    %c2 = arith.constant 2 : index
    %c0_45 = arith.constant 0 : index
    %c0_46 = arith.constant 0 : index
    %97 = vector.load %arg1[%c0_44, %c2, %c0_45, %c0_46] : memref<2x4x16x128xf32, #tpu.memory_space<vmem>>, vector<1x1x16x128xf32>
    %98 = vector.shape_cast %97 : vector<1x1x16x128xf32> to vector<16x128xf32>
    %cst_47 = arith.constant 1.000000e-03 : f32
    %99 = vector.broadcast %cst_47 : f32 to vector<16x128xf32>
    %100 = arith.mulf %98, %99 : vector<16x128xf32>
    %cst_48 = arith.constant 0.000000e+00 : f32
    %101 = vector.broadcast %cst_48 : f32 to vector<16x128xf32>
    %102 = arith.addf %100, %101 : vector<16x128xf32>
    %c0_49 = arith.constant 0 : index
    %c3 = arith.constant 3 : index
    %c0_50 = arith.constant 0 : index
    %c0_51 = arith.constant 0 : index
    %103 = vector.load %arg1[%c0_49, %c3, %c0_50, %c0_51] : memref<2x4x16x128xf32, #tpu.memory_space<vmem>>, vector<1x1x16x128xf32>
    %104 = vector.shape_cast %103 : vector<1x1x16x128xf32> to vector<16x128xf32>
    %cst_52 = arith.constant 0.00999999977 : f32
    %105 = vector.broadcast %cst_52 : f32 to vector<16x128xf32>
    %106 = arith.mulf %104, %105 : vector<16x128xf32>
    %cst_53 = arith.constant 5.000000e-03 : f32
    %107 = vector.broadcast %cst_53 : f32 to vector<16x128xf32>
    %108 = arith.addf %106, %107 : vector<16x128xf32>
    %109 = arith.mulf %78, %102 : vector<16x128xf32>
    %cst_54 = arith.constant 2.000000e-01 : f32
    %110 = vector.broadcast %cst_54 : f32 to vector<16x128xf32>
    %111 = arith.mulf %87, %110 : vector<16x128xf32>
    %112 = arith.subf %109, %111 : vector<16x128xf32>
    %c15_i32_55 = arith.constant 15 : i32
    %113 = tpu.dynamic_rotate %112 by %c15_i32_55 dim 0 : vector<16x128xf32>, i32 -> vector<16x128xf32>
    %c1_i32_56 = arith.constant 1 : i32
    %114 = tpu.dynamic_rotate %112 by %c1_i32_56 dim 0 : vector<16x128xf32>, i32 -> vector<16x128xf32>
    %115 = arith.subf %113, %114 : vector<16x128xf32>
    %cst_57 = arith.constant 5.000000e-01 : f32
    %116 = vector.broadcast %cst_57 : f32 to vector<16x128xf32>
    %117 = arith.mulf %116, %115 : vector<16x128xf32>
    %118 = arith.subf %113, %112 : vector<16x128xf32>
    %119 = arith.select %3, %118, %117 : vector<16x128xi1>, vector<16x128xf32>
    %120 = arith.subf %112, %114 : vector<16x128xf32>
    %121 = arith.select %5, %120, %119 : vector<16x128xi1>, vector<16x128xf32>
    %122 = arith.mulf %78, %108 : vector<16x128xf32>
    %cst_58 = arith.constant 2.000000e-01 : f32
    %123 = vector.broadcast %cst_58 : f32 to vector<16x128xf32>
    %124 = arith.mulf %96, %123 : vector<16x128xf32>
    %125 = arith.subf %122, %124 : vector<16x128xf32>
    %c127_i32_59 = arith.constant 127 : i32
    %126 = tpu.dynamic_rotate %125 by %c127_i32_59 dim 1 : vector<16x128xf32>, i32 -> vector<16x128xf32>
    %c1_i32_60 = arith.constant 1 : i32
    %127 = tpu.dynamic_rotate %125 by %c1_i32_60 dim 1 : vector<16x128xf32>, i32 -> vector<16x128xf32>
    %128 = arith.subf %126, %127 : vector<16x128xf32>
    %cst_61 = arith.constant 5.000000e-01 : f32
    %129 = vector.broadcast %cst_61 : f32 to vector<16x128xf32>
    %130 = arith.mulf %129, %128 : vector<16x128xf32>
    %131 = arith.subf %126, %125 : vector<16x128xf32>
    %132 = arith.select %7, %131, %130 : vector<16x128xi1>, vector<16x128xf32>
    %133 = arith.subf %125, %127 : vector<16x128xf32>
    %134 = arith.select %9, %133, %132 : vector<16x128xi1>, vector<16x128xf32>
    %135 = arith.addf %121, %134 : vector<16x128xf32>
    %cst_62 = arith.constant 2.000000e-01 : f32
    %136 = vector.broadcast %cst_62 : f32 to vector<16x128xf32>
    %137 = arith.mulf %135, %136 : vector<16x128xf32>
    %138 = arith.subf %137, %70 : vector<16x128xf32>
    %cst_63 = arith.constant 0.000000e+00 : f32
    %139 = vector.broadcast %cst_63 : f32 to vector<16x128xf32>
    %140 = arith.select %22, %138, %139 : vector<16x128xi1>, vector<16x128xf32>
    %141 = arith.mulf %140, %140 : vector<16x128xf32>
    %142 = vector.shape_cast %141 : vector<16x128xf32> to vector<1x16x128xf32>
    %cst_64 = arith.constant dense<0.000000e+00> : vector<1xf32>
    %143 = vector.multi_reduction <add>, %142, %cst_64 [1, 2] : vector<1x16x128xf32> to vector<1xf32>
    %144 = vector.shape_cast %143 : vector<1xf32> to vector<1x1x1xf32>
    %145 = vector.extract %144[0, 0, 0] : f32 from vector<1x1x1xf32>
    %cst_65 = arith.constant 0.000000e+00 : f32
    %146 = arith.addf %cst_65, %145 : f32
    %c1_66 = arith.constant 1 : index
    %c0_67 = arith.constant 0 : index
    %c0_68 = arith.constant 0 : index
    %c0_69 = arith.constant 0 : index
    %147 = vector.load %arg2[%c1_66, %c0_67, %c0_68, %c0_69] : memref<2x1x16x128xf32, #tpu.memory_space<vmem>>, vector<1x1x16x128xf32>
    %148 = vector.shape_cast %147 : vector<1x1x16x128xf32> to vector<16x128xf32>
    %cst_70 = arith.constant 5.000000e+00 : f32
    %149 = vector.broadcast %cst_70 : f32 to vector<16x128xf32>
    %150 = arith.mulf %148, %149 : vector<16x128xf32>
    %cst_71 = arith.constant 1.060000e+01 : f32
    %151 = vector.broadcast %cst_71 : f32 to vector<16x128xf32>
    %152 = arith.addf %150, %151 : vector<16x128xf32>
    %c1_72 = arith.constant 1 : index
    %c1_73 = arith.constant 1 : index
    %c0_74 = arith.constant 0 : index
    %c0_75 = arith.constant 0 : index
    %153 = vector.load %arg1[%c1_72, %c1_73, %c0_74, %c0_75] : memref<2x4x16x128xf32, #tpu.memory_space<vmem>>, vector<1x1x16x128xf32>
    %154 = vector.shape_cast %153 : vector<1x1x16x128xf32> to vector<16x128xf32>
    %cst_76 = arith.constant 1.000000e+05 : f32
    %155 = vector.broadcast %cst_76 : f32 to vector<16x128xf32>
    %156 = arith.mulf %154, %155 : vector<16x128xf32>
    %cst_77 = arith.constant 9.100000e+05 : f32
    %157 = vector.broadcast %cst_77 : f32 to vector<16x128xf32>
    %158 = arith.addf %156, %157 : vector<16x128xf32>
    %cst_78 = arith.constant 2.731500e+02 : f32
    %159 = vector.broadcast %cst_78 : f32 to vector<16x128xf32>
    %160 = arith.addf %152, %159 : vector<16x128xf32>
    %cst_79 = arith.constant 2.770000e+02 : f32
    %161 = vector.broadcast %cst_79 : f32 to vector<16x128xf32>
    %162 = arith.subf %160, %161 : vector<16x128xf32>
    %cst_80 = arith.constant 3.000000e-04 : f32
    %163 = vector.broadcast %cst_80 : f32 to vector<16x128xf32>
    %164 = arith.mulf %163, %162 : vector<16x128xf32>
    %cst_81 = arith.constant 1.000000e+00 : f32
    %165 = vector.broadcast %cst_81 : f32 to vector<16x128xf32>
    %166 = arith.subf %165, %164 : vector<16x128xf32>
    %cst_82 = arith.constant 1.000000e+03 : f32
    %167 = vector.broadcast %cst_82 : f32 to vector<16x128xf32>
    %168 = arith.mulf %167, %166 : vector<16x128xf32>
    %cst_83 = arith.constant 4.500000e-10 : f32
    %169 = vector.broadcast %cst_83 : f32 to vector<16x128xf32>
    %170 = arith.mulf %169, %158 : vector<16x128xf32>
    %cst_84 = arith.constant 1.000000e+00 : f32
    %171 = vector.broadcast %cst_84 : f32 to vector<16x128xf32>
    %172 = arith.addf %171, %170 : vector<16x128xf32>
    %173 = arith.mulf %168, %172 : vector<16x128xf32>
    %cst_85 = arith.constant 55.5092964 : f32
    %174 = vector.broadcast %cst_85 : f32 to vector<16x128xf32>
    %175 = arith.mulf %173, %174 : vector<16x128xf32>
    %cst_86 = arith.constant 4.032000e-02 : f32
    %176 = vector.broadcast %cst_86 : f32 to vector<16x128xf32>
    %177 = arith.mulf %176, %173 : vector<16x128xf32>
    %c1_87 = arith.constant 1 : index
    %c0_88 = arith.constant 0 : index
    %c0_89 = arith.constant 0 : index
    %c0_90 = arith.constant 0 : index
    %178 = vector.load %arg1[%c1_87, %c0_88, %c0_89, %c0_90] : memref<2x4x16x128xf32, #tpu.memory_space<vmem>>, vector<1x1x16x128xf32>
    %179 = vector.shape_cast %178 : vector<1x1x16x128xf32> to vector<16x128xf32>
    %180 = arith.mulf %177, %179 : vector<16x128xf32>
    %c15_i32_91 = arith.constant 15 : i32
    %181 = tpu.dynamic_rotate %180 by %c15_i32_91 dim 0 : vector<16x128xf32>, i32 -> vector<16x128xf32>
    %cst_92 = arith.constant 0.000000e+00 : f32
    %182 = vector.broadcast %cst_92 : f32 to vector<16x128xf32>
    %183 = arith.select %11, %181, %182 : vector<16x128xi1>, vector<16x128xf32>
    %c1_i32_93 = arith.constant 1 : i32
    %184 = tpu.dynamic_rotate %180 by %c1_i32_93 dim 0 : vector<16x128xf32>, i32 -> vector<16x128xf32>
    %cst_94 = arith.constant 0.000000e+00 : f32
    %185 = vector.broadcast %cst_94 : f32 to vector<16x128xf32>
    %186 = arith.select %13, %184, %185 : vector<16x128xi1>, vector<16x128xf32>
    %187 = arith.subf %183, %186 : vector<16x128xf32>
    %c1_i32_95 = arith.constant 1 : i32
    %188 = tpu.dynamic_rotate %187 by %c1_i32_95 dim 1 : vector<16x128xf32>, i32 -> vector<16x128xf32>
    %cst_96 = arith.constant 0.000000e+00 : f32
    %189 = vector.broadcast %cst_96 : f32 to vector<16x128xf32>
    %190 = arith.select %17, %188, %189 : vector<16x128xi1>, vector<16x128xf32>
    %c127_i32_97 = arith.constant 127 : i32
    %191 = tpu.dynamic_rotate %187 by %c127_i32_97 dim 1 : vector<16x128xf32>, i32 -> vector<16x128xf32>
    %cst_98 = arith.constant 0.000000e+00 : f32
    %192 = vector.broadcast %cst_98 : f32 to vector<16x128xf32>
    %193 = arith.select %15, %191, %192 : vector<16x128xi1>, vector<16x128xf32>
    %194 = arith.subf %190, %193 : vector<16x128xf32>
    %cst_99 = arith.constant 2.731500e+02 : f32
    %195 = vector.broadcast %cst_99 : f32 to vector<16x128xf32>
    %196 = arith.addf %152, %195 : vector<16x128xf32>
    %cst_100 = arith.constant 7.540000e+01 : f32
    %197 = vector.broadcast %cst_100 : f32 to vector<16x128xf32>
    %198 = arith.mulf %197, %196 : vector<16x128xf32>
    %cst_101 = arith.constant 1.800000e-05 : f32
    %199 = vector.broadcast %cst_101 : f32 to vector<16x128xf32>
    %200 = arith.mulf %199, %158 : vector<16x128xf32>
    %201 = arith.addf %198, %200 : vector<16x128xf32>
    %202 = arith.mulf %175, %201 : vector<16x128xf32>
    %c15_i32_102 = arith.constant 15 : i32
    %203 = tpu.dynamic_rotate %152 by %c15_i32_102 dim 0 : vector<16x128xf32>, i32 -> vector<16x128xf32>
    %c1_i32_103 = arith.constant 1 : i32
    %204 = tpu.dynamic_rotate %152 by %c1_i32_103 dim 0 : vector<16x128xf32>, i32 -> vector<16x128xf32>
    %205 = arith.subf %203, %204 : vector<16x128xf32>
    %cst_104 = arith.constant 5.000000e-01 : f32
    %206 = vector.broadcast %cst_104 : f32 to vector<16x128xf32>
    %207 = arith.mulf %206, %205 : vector<16x128xf32>
    %208 = arith.subf %203, %152 : vector<16x128xf32>
    %209 = arith.select %3, %208, %207 : vector<16x128xi1>, vector<16x128xf32>
    %210 = arith.subf %152, %204 : vector<16x128xf32>
    %211 = arith.select %5, %210, %209 : vector<16x128xi1>, vector<16x128xf32>
    %c127_i32_105 = arith.constant 127 : i32
    %212 = tpu.dynamic_rotate %152 by %c127_i32_105 dim 1 : vector<16x128xf32>, i32 -> vector<16x128xf32>
    %c1_i32_106 = arith.constant 1 : i32
    %213 = tpu.dynamic_rotate %152 by %c1_i32_106 dim 1 : vector<16x128xf32>, i32 -> vector<16x128xf32>
    %214 = arith.subf %212, %213 : vector<16x128xf32>
    %cst_107 = arith.constant 5.000000e-01 : f32
    %215 = vector.broadcast %cst_107 : f32 to vector<16x128xf32>
    %216 = arith.mulf %215, %214 : vector<16x128xf32>
    %217 = arith.subf %212, %152 : vector<16x128xf32>
    %218 = arith.select %7, %217, %216 : vector<16x128xi1>, vector<16x128xf32>
    %219 = arith.subf %152, %213 : vector<16x128xf32>
    %220 = arith.select %9, %219, %218 : vector<16x128xi1>, vector<16x128xf32>
    %c1_108 = arith.constant 1 : index
    %c2_109 = arith.constant 2 : index
    %c0_110 = arith.constant 0 : index
    %c0_111 = arith.constant 0 : index
    %221 = vector.load %arg1[%c1_108, %c2_109, %c0_110, %c0_111] : memref<2x4x16x128xf32, #tpu.memory_space<vmem>>, vector<1x1x16x128xf32>
    %222 = vector.shape_cast %221 : vector<1x1x16x128xf32> to vector<16x128xf32>
    %cst_112 = arith.constant 1.000000e-03 : f32
    %223 = vector.broadcast %cst_112 : f32 to vector<16x128xf32>
    %224 = arith.mulf %222, %223 : vector<16x128xf32>
    %cst_113 = arith.constant 0.000000e+00 : f32
    %225 = vector.broadcast %cst_113 : f32 to vector<16x128xf32>
    %226 = arith.addf %224, %225 : vector<16x128xf32>
    %c1_114 = arith.constant 1 : index
    %c3_115 = arith.constant 3 : index
    %c0_116 = arith.constant 0 : index
    %c0_117 = arith.constant 0 : index
    %227 = vector.load %arg1[%c1_114, %c3_115, %c0_116, %c0_117] : memref<2x4x16x128xf32, #tpu.memory_space<vmem>>, vector<1x1x16x128xf32>
    %228 = vector.shape_cast %227 : vector<1x1x16x128xf32> to vector<16x128xf32>
    %cst_118 = arith.constant 0.00999999977 : f32
    %229 = vector.broadcast %cst_118 : f32 to vector<16x128xf32>
    %230 = arith.mulf %228, %229 : vector<16x128xf32>
    %cst_119 = arith.constant 5.000000e-03 : f32
    %231 = vector.broadcast %cst_119 : f32 to vector<16x128xf32>
    %232 = arith.addf %230, %231 : vector<16x128xf32>
    %233 = arith.mulf %202, %226 : vector<16x128xf32>
    %cst_120 = arith.constant 2.000000e-01 : f32
    %234 = vector.broadcast %cst_120 : f32 to vector<16x128xf32>
    %235 = arith.mulf %211, %234 : vector<16x128xf32>
    %236 = arith.subf %233, %235 : vector<16x128xf32>
    %c15_i32_121 = arith.constant 15 : i32
    %237 = tpu.dynamic_rotate %236 by %c15_i32_121 dim 0 : vector<16x128xf32>, i32 -> vector<16x128xf32>
    %c1_i32_122 = arith.constant 1 : i32
    %238 = tpu.dynamic_rotate %236 by %c1_i32_122 dim 0 : vector<16x128xf32>, i32 -> vector<16x128xf32>
    %239 = arith.subf %237, %238 : vector<16x128xf32>
    %cst_123 = arith.constant 5.000000e-01 : f32
    %240 = vector.broadcast %cst_123 : f32 to vector<16x128xf32>
    %241 = arith.mulf %240, %239 : vector<16x128xf32>
    %242 = arith.subf %237, %236 : vector<16x128xf32>
    %243 = arith.select %3, %242, %241 : vector<16x128xi1>, vector<16x128xf32>
    %244 = arith.subf %236, %238 : vector<16x128xf32>
    %245 = arith.select %5, %244, %243 : vector<16x128xi1>, vector<16x128xf32>
    %246 = arith.mulf %202, %232 : vector<16x128xf32>
    %cst_124 = arith.constant 2.000000e-01 : f32
    %247 = vector.broadcast %cst_124 : f32 to vector<16x128xf32>
    %248 = arith.mulf %220, %247 : vector<16x128xf32>
    %249 = arith.subf %246, %248 : vector<16x128xf32>
    %c127_i32_125 = arith.constant 127 : i32
    %250 = tpu.dynamic_rotate %249 by %c127_i32_125 dim 1 : vector<16x128xf32>, i32 -> vector<16x128xf32>
    %c1_i32_126 = arith.constant 1 : i32
    %251 = tpu.dynamic_rotate %249 by %c1_i32_126 dim 1 : vector<16x128xf32>, i32 -> vector<16x128xf32>
    %252 = arith.subf %250, %251 : vector<16x128xf32>
    %cst_127 = arith.constant 5.000000e-01 : f32
    %253 = vector.broadcast %cst_127 : f32 to vector<16x128xf32>
    %254 = arith.mulf %253, %252 : vector<16x128xf32>
    %255 = arith.subf %250, %249 : vector<16x128xf32>
    %256 = arith.select %7, %255, %254 : vector<16x128xi1>, vector<16x128xf32>
    %257 = arith.subf %249, %251 : vector<16x128xf32>
    %258 = arith.select %9, %257, %256 : vector<16x128xi1>, vector<16x128xf32>
    %259 = arith.addf %245, %258 : vector<16x128xf32>
    %cst_128 = arith.constant 2.000000e-01 : f32
    %260 = vector.broadcast %cst_128 : f32 to vector<16x128xf32>
    %261 = arith.mulf %259, %260 : vector<16x128xf32>
    %262 = arith.subf %261, %194 : vector<16x128xf32>
    %cst_129 = arith.constant 0.000000e+00 : f32
    %263 = vector.broadcast %cst_129 : f32 to vector<16x128xf32>
    %264 = arith.select %22, %262, %263 : vector<16x128xi1>, vector<16x128xf32>
    %265 = arith.mulf %264, %264 : vector<16x128xf32>
    %266 = vector.shape_cast %265 : vector<16x128xf32> to vector<1x16x128xf32>
    %cst_130 = arith.constant dense<0.000000e+00> : vector<1xf32>
    %267 = vector.multi_reduction <add>, %266, %cst_130 [1, 2] : vector<1x16x128xf32> to vector<1xf32>
    %268 = vector.shape_cast %267 : vector<1xf32> to vector<1x1x1xf32>
    %269 = vector.extract %268[0, 0, 0] : f32 from vector<1x1x1xf32>
    %270 = arith.addf %146, %269 : f32
    %271 = vector.broadcast %270 : f32 to vector<8x128xf32>
    %c0_131 = arith.constant 0 : index
    %c0_132 = arith.constant 0 : index
    %c0_133 = arith.constant 0 : index
    %272 = vector.load %arg3[%c0_131, %c0_132, %c0_133] : memref<1x8x128xf32, #tpu.memory_space<vmem>>, vector<1x8x128xf32>
    %273 = vector.shape_cast %272 : vector<1x8x128xf32> to vector<8x128xf32>
    %274 = vector.shape_cast %271 : vector<8x128xf32> to vector<1x8x128xf32>
    tpu.vector_store %arg3[%c0_131, %c0_132, %c0_133], %274 {strides = array<i32>} : memref<1x8x128xf32, #tpu.memory_space<vmem>>, vector<1x8x128xf32>,
    return
  }
  func.func @transform_0(%arg0: i32) -> (i32, i32, i32, i32) {
    %c0_i32 = arith.constant 0 : i32
    %c0_i32_0 = arith.constant 0 : i32
    %c0_i32_1 = arith.constant 0 : i32
    %c0_i32_2 = arith.constant 0 : i32
    return %arg0, %c0_i32, %c0_i32_0, %c0_i32_1 : i32, i32, i32, i32
  }
  func.func @transform_1(%arg0: i32) -> (i32, i32, i32, i32) {
    %c0_i32 = arith.constant 0 : i32
    %c0_i32_0 = arith.constant 0 : i32
    %c0_i32_1 = arith.constant 0 : i32
    %c0_i32_2 = arith.constant 0 : i32
    return %arg0, %c0_i32, %c0_i32_0, %c0_i32_1 : i32, i32, i32, i32
  }
  func.func @transform_2(%arg0: i32) -> (i32, i32, i32) {
    %c0_i32 = arith.constant 0 : i32
    %c0_i32_0 = arith.constant 0 : i32
    %c0_i32_1 = arith.constant 0 : i32
    return %arg0, %c0_i32, %c0_i32_0 : i32, i32, i32
  }
}

</mosaic_0001>

<bundles_post_ra>
// kernel: fn.1
= control target key start
LH: loop header
LB: loop body
LE: loop exit
PB: predicated region body
PF: predicated region fallthrough
CT: control target
= control target key end

     0   :  { %s469_s19 = smov 1   ;;  %s470_s20 = smov 127   ;;  %v11_v22 = vlaneseq  ;;  %s902_s1 = inlined_call_operand.vmem [shape: f32[2,1,16,128], index: 1, kind: input, shape index: {}]   ;;  %s903_s0 = inlined_call_operand.vmem [shape: f32[2,4,16,128], index: 0, kind: input, shape index: {}]   ;;  %s904_s2 = inlined_call_operand.vmem [shape: f32[1,8,128], index: 2, kind: output, shape index: {}]  }
   0x1   :  { %v33_v0 = vld [vmem:[%s902_s1] sm:$0xff]  ;;  %v34_v1 = vld [vmem:[%s902_s1 + $0x8] sm:$0xff]  ;;  %v451_v4 = vld [vmem:[%s902_s1 + $0x10] sm:$0xff] }
   0x2   :  { %v35_v2 = vmul.f32 5.0, %v33_v0  ;;  %v36_v3 = vmul.f32 5.0, %v34_v1  ;;  %v443_v5 = vld [vmem:[%s903_s0 + $0x10] sm:$0xff]  ;;  %v238_v6 = vmul.f32 5.0, %v451_v4  ;;  %v444_v7 = vld [vmem:[%s903_s0 + $0x18] sm:$0xff]  ;;  %v533_v31 = vshrl.u32 %v11_v22, 7 }
   0x3   :  { %v42_v8 = vmul.f32 100000.0, %v443_v5  ;;  %v43_v12 = vmul.f32 100000.0, %v444_v7  ;;  %v452_v14 = vld [vmem:[%s902_s1 + $0x18] sm:$0xff]  ;;  %v66_v37 = vld [vmem:[%s903_s0] sm:$0xff]  ;;  %v67_v38 = vld [vmem:[%s903_s0 + $0x8] sm:$0xff] }
   0x4   :  { %v501_v9 = vadd.f32 10.6, %v35_v2  ;;  %v503_v10 = vadd.f32 10.6, %v36_v3  ;;  %v505_v11 = vadd.f32 10.6, %v238_v6 }
   0x5   :  { %v507_v13 = vadd.f32 910000.0, %v42_v8  ;;  %v524_v17 = vadd.f32 910000.0, %v43_v12  ;;  %v239_v21 = vmul.f32 5.0, %v452_v14  ;;  %v546_v36 = vadd.s32 8, %v533_v31 }
   0x6   :  { %132 = vrot.lane.b32.xlu1 %v501_v9, %s469_s19  ;;  %128 = vrot.lane.b32.xlu0 %v501_v9, %s470_s20  ;;  %v517_v15 = vadd.f32 273.15, %v501_v9  ;;  %v520_v16 = vadd.f32 273.15, %v503_v10  ;;  %vm72_vm1 = vcmp.lt.s32.totalorder %v533_v31, 7  ;;  %vm79_vm2 = vcmp.lt.s32.totalorder %v533_v31, 1 }
   0x7   :  { %330 = vrot.lane.b32.xlu2 %v505_v11, %s470_s20  ;;  %v56_v20 = vmul.f32 4.5e-10, %v507_v13  ;;  %v57_v23 = vmul.f32 4.5e-10, %v524_v17  ;;  %v530_v30 = vadd.f32 10.6, %v239_v21 }
   0x8   :  { %v445_v18 = vadd.f32 -277.0, %v517_v15  ;;  %v446_v19 = vadd.f32 -277.0, %v520_v16  ;;  %vm23_vm0 = vcmp.lt.s32.totalorder %v546_v36, 15  ;;  %vm24_vm3 = vcmp.ge.s32.totalorder %v533_v31, 1  ;;  %v453_v57 = vld [vmem:[%s903_s0 + $0x50] sm:$0xff]  ;;  %v454_v58 = vld [vmem:[%s903_s0 + $0x58] sm:$0xff] }
   0x9   :  { %v58_v28 = vadd.f32 1.0, %v56_v20  ;;  %v59_v29 = vadd.f32 1.0, %v57_v23  ;;  %v581_v55 = vadd.f32 273.15, %v505_v11  ;;  %v250_v56 = vadd.f32 273.15, %v530_v30 }
   0xa   :  { %v50_v24 = vmul.f32 0.0003, %v445_v18  ;;  %v51_v25 = vmul.f32 0.0003, %v446_v19  ;;  %v245_v59 = vmul.f32 100000.0, %v453_v57  ;;  %v246_v60 = vmul.f32 100000.0, %v454_v58 }
   0xb   :  { %v455_v61 = vadd.f32 -277.0, %v581_v55  ;;  %v456_v62 = vadd.f32 -277.0, %v250_v56  ;;  %v457_v23 = vld [vmem:[%s903_s0 + $0x40] sm:$0xff]  ;;  %v103_v57 = vmul.f32 1.8e-05, %v524_v17  ;;  %vm19_vm4 = vcmp.eq.s32.totalorder %v546_v36, 15 }
   0xc   :  { %v52_v26 = vsub.f32 1.0, %v50_v24  ;;  %v53_v27 = vsub.f32 1.0, %v51_v25  ;;  %v591_v63 = vadd.f32 910000.0, %v245_v59  ;;  %v248_v0 = vadd.f32 910000.0, %v246_v60 }
   0xd   :  { %v253_v1 = vmul.f32 0.0003, %v455_v61  ;;  %v254_v2 = vmul.f32 0.0003, %v456_v62  ;;  %v458_v24 = vld [vmem:[%s903_s0 + $0x48] sm:$0xff]  ;;  %vm16_vm7 = vcmp.eq.s32.totalorder %v533_v31, 0 }
   0xe   :  { %134 = vrot.lane.b32.xlu1 %v503_v10, %s469_s19  ;;  %130 = vrot.lane.b32.xlu0 %v503_v10, %s470_s20  ;;  %v54_v32 = vmul.f32 1000.0, %v52_v26  ;;  %v55_v33 = vmul.f32 1000.0, %v53_v27  ;;  %v259_v4 = vmul.f32 4.5e-10, %v591_v63  ;;  %v260_v5 = vmul.f32 4.5e-10, %v248_v0 }
   0xf   :  { %332 = vrot.lane.b32.xlu2 %v530_v30, %s470_s20  ;;  %v255_v3 = vsub.f32 1.0, %v253_v1  ;;  %v256_v6 = vsub.f32 1.0, %v254_v2 }
  0x10   :  { %v541_v34 = vmul.f32 %v58_v28, %v54_v32  ;;  %v543_v35 = vmul.f32 %v59_v29, %v55_v33  ;;  %v261_v8 = vadd.f32 1.0, %v259_v4  ;;  %v262_v12 = vadd.f32 1.0, %v260_v5 }
  0x11   :  { %v257_v7 = vmul.f32 1000.0, %v255_v3  ;;  %v258_v14 = vmul.f32 1000.0, %v256_v6  ;;  %v303_v3 = vmul.f32 75.4, %v250_v56  ;;  %v305_v4 = vmul.f32 1.8e-05, %v248_v0 }
  0x12   :  { %v64_v39 = vmul.f32 0.04032, %v541_v34  ;;  %v65_v40 = vmul.f32 0.04032, %v543_v35  ;;  %v63_v62 = vmul.f32 55.509296, %v543_v35 }
  0x13   :  { %v594_v18 = vmul.f32 %v261_v8, %v257_v7  ;;  %v264_v19 = vmul.f32 %v262_v12, %v258_v14  ;;  %v100_v8 = vmul.f32 75.4, %v517_v15  ;;  %v102_v35 = vmul.f32 1.8e-05, %v507_v13  ;;  %v449_v56 = vld [vmem:[%s903_s0 + $0x30] sm:$0xff] }
  0x14   :  { %v68_v41 = vmul.f32 %v66_v37, %v64_v39  ;;  %v69_v42 = vmul.f32 %v67_v38, %v65_v40  ;;  %v108_v40 = vrot.slane %v501_v9, 1  ;;  %v307_v14 = vadd.f32 %v305_v4, %v303_v3 }
  0x15   :  { %v267_v20 = vmul.f32 0.04032, %v594_v18  ;;  %v268_v21 = vmul.f32 0.04032, %v264_v19  ;;  %v266_v12 = vmul.f32 55.509296, %v264_v19 }
  0x16   :  { %336 = vrot.lane.b32.xlu1 %v530_v30, %s469_s19  ;;  %334 = vrot.lane.b32.xlu0 %v505_v11, %s469_s19  ;;  %v70_v43 = vrot.slane %v68_v41, 1  ;;  %v71_v44 = vrot.slane %v69_v42, 1  ;;  %v77_v45 = vrot.slane %v68_v41, 7  ;;  %v78_v46 = vrot.slane %v69_v42, 7 }
  0x17   :  { %v603_v25 = vmul.f32 %v457_v23, %v267_v20  ;;  %v605_v26 = vmul.f32 %v458_v24, %v268_v21  ;;  %v109_v41 = vrot.slane %v503_v10, 1  ;;  %v112_v42 = vrot.slane %v501_v9, 7  ;;  %v460_v24 = vld [vmem:[%s903_s0 + $0x68] sm:$0xff] }
  0x18   :  { %v74_v47 = vsel %vm72_vm1, %v71_v44, %v70_v43  ;;  %v80_v48 = vsel %vm79_vm2, %v77_v45, %v78_v46  ;;  %v73_v49 = vsel %vm72_vm1, %v70_v43, %v71_v44  ;;  %v81_v50 = vsel %vm79_vm2, %v78_v46, %v77_v45 }
  0x19   :  { %v76_v51 = vsel %vm23_vm0, %v74_v47, 0.0  ;;  %v82_v52 = vsel %vm24_vm3, %v81_v50, 0.0  ;;  %v280_v27 = vrot.slane %v603_v25, 7  ;;  %v274_v28 = vrot.slane %v603_v25, 1 }
  0x1a   :  { %v85_v53 = vsub.f32 %v76_v51, %v80_v48  ;;  %v84_v54 = vsub.f32 %v73_v49, %v82_v52  ;;  %v275_v29 = vrot.slane %v605_v26, 1  ;;  %v281_v32 = vrot.slane %v605_v26, 7 }
  0x1b   :  { %v113_v43 = vrot.slane %v503_v10, 7  ;;  %v310_v44 = vrot.slane %v505_v11, 1  ;;  %v311_v45 = vrot.slane %v530_v30, 1  ;;  %v314_v46 = vrot.slane %v505_v11, 7 }
  0x1c   :  { %88 = vrot.lane.b32.xlu2 %v85_v53, %s469_s19  ;;  %v276_v33 = vsel %vm72_vm1, %v274_v28, %v275_v29  ;;  %v283_v37 = vsel %vm79_vm2, %v281_v32, %v280_v27  ;;  %v315_v47 = vrot.slane %v530_v30, 7  ;;  %v111_v48 = vsel %vm72_vm1, %v109_v41, %v108_v40 }
  0x1d   :  { %v284_v38 = vsel %vm24_vm3, %v283_v37, 0.0  ;;  %v114_v49 = vsel %vm79_vm2, %v112_v42, %v113_v43  ;;  %v313_v51 = vsel %vm72_vm1, %v311_v45, %v310_v44  ;;  %v62_v21 = vmul.f32 55.509296, %v541_v34 }
  0x1e   :  { %86 = vrot.lane.b32.xlu1 %v84_v54, %s469_s19  ;;  %92 = vrot.lane.b32.xlu0 %v84_v54, %s470_s20  ;;  %v625_v39 = vsub.f32 %v276_v33, %v284_v38  ;;  %v117_v50 = vsub.f32 %v111_v48, %v114_v49  ;;  %v316_v52 = vsel %vm79_vm2, %v314_v46, %v315_v47  ;;  %v101_v54 = vmul.f32 75.4, %v520_v16  ;;  %v448_v16 = vld [vmem:[%s903_s0 + $0x28] sm:$0xff] }
  0x1f   :  { %v125_v59 = vsub.f32 %v503_v10, %v114_v49  ;;  %v327_v61 = vsub.f32 %v530_v30, %v316_v52  ;;  %v152_v7 = vmul.f32 0.001, %v448_v16  ;;  %v104_v33 = vadd.f32 %v102_v35, %v100_v8 }
  0x20   :  { %v119_v58 = vmul.f32 0.5, %v117_v50  ;;  %v105_v1 = vadd.f32 %v103_v57, %v101_v54  ;;  %v158_v15 = vmul.f32 0.01, %v449_v56  ;;  %v685_v37 = vmul.f32 %v307_v14, %v266_v12 }
  0x21   :  { %v354_v13 = vmul.f32 0.001, %v460_v24  ;;  %v688_v19 = vand.u32 127, %v11_v22  ;;  %v691_v34 = vmul.f32 %v104_v33, %v62_v21  ;;  %v450_v22 = vld [vmem:[%s903_s0 + $0x38] sm:$0xff]  ;;  %v302_v25 = vmul.f32 75.4, %v581_v55 }
  0x22   :  { %v127_v2 = vsel %vm19_vm4, %v125_v59, %v119_v58  ;;  %v107_v6 = vmul.f32 %v105_v1, %v63_v62  ;;  %v277_v59 = vsel %vm72_vm1, %v275_v29, %v274_v28  ;;  %v159_v3 = vmul.f32 0.01, %v450_v22 }
  0x23   :  { %v165_v17 = vmul.f32 0.2, %v127_v2  ;;  %v365_v38 = vmul.f32 %v354_v13, %v685_v37  ;;  %vm20_vm5 = vcmp.eq.s32.totalorder %v688_v19, 0  ;;  %vm21_vm6 = vcmp.eq.s32.totalorder %v688_v19, 15 }
  0x24   :  { %288 = vrot.lane.b32.xlu2 %v625_v39, %s469_s19  ;;  %v163_v0 = vmul.f32 %v152_v7, %v107_v6  ;;  %v279_v1 = vsel %vm23_vm0, %v277_v59, 0.0  ;;  %v462_v7 = vld [vmem:[%s903_s0 + $0x78] sm:$0xff]  ;;  %vm27_vm8 = vcmp.ge.s32.totalorder %v688_v19, 1  ;;  %vm26_vm9 = vcmp.lt.s32.totalorder %v688_v19, 15 }
  0x25   :  { %vm30_vm10 = vcmp.lt.s32.totalorder %v688_v19, 16 }
  0x26   :  { %94 = vrot.lane.b32.xlu1 %v85_v53, %s470_s20  ;;  %v319_v53 = vsub.f32 %v313_v51, %v316_v52  ;;  %v680_v23 = vsub.f32 %v163_v0, %v165_v17  ;;  %v160_v51 = vadd.f32 0.005, %v158_v15  ;;  %v161_v17 = vadd.f32 0.005, %v159_v3 }
  0x27   :  { %v361_v0 = vmul.f32 0.01, %v462_v7 }
  0x28   :  { %v321_v60 = vmul.f32 0.5, %v319_v53  ;;  %v188_v62 = vmul.f32 %v160_v51, %v691_v34  ;;  %v189_v24 = vmul.f32 %v161_v17, %v107_v6 }
  0x29   :  { %v363_v51 = vadd.f32 0.005, %v361_v0 }
  0x2a   :  { %v329_v5 = vsel %vm19_vm4, %v327_v61, %v321_v60  ;;  %v282_v60 = vsel %vm79_vm2, %v280_v27, %v281_v32  ;;  %v304_v27 = vmul.f32 1.8e-05, %v591_v63  ;;  %v265_v63 = vmul.f32 55.509296, %v594_v18 }
  0x2b   :  { %v367_v20 = vmul.f32 0.2, %v329_v5  ;;  %v287_v28 = vsub.f32 %v279_v1, %v282_v60  ;;  %v461_v5 = vld [vmem:[%s903_s0 + $0x70] sm:$0xff]  ;;  %v391_v1 = vmul.f32 %v363_v51, %v685_v37  ;;  %v447_v37 = vld [vmem:[%s903_s0 + $0x20] sm:$0xff] }
  0x2c   :  { %v306_v12 = vadd.f32 %v304_v27, %v302_v25  ;;  %v360_v56 = vmul.f32 0.01, %v461_v5  ;;  %v151_v25 = vmul.f32 0.001, %v447_v37  ;;  %v110_v27 = vsel %vm72_vm1, %v108_v40, %v109_v41 }
  0x2d   :  { %v693_v52 = vsub.f32 %v365_v38, %v367_v20  ;;  %v120_v17 = vsub.f32 %v110_v27, %v501_v9  ;;  %v169_v40 = vrot.slane %v680_v23, 1  ;;  %v173_v41 = vrot.slane %v680_v23, 7 }
  0x2e   :  { %v362_v18 = vadd.f32 0.005, %v360_v56  ;;  %v162_v5 = vmul.f32 %v151_v25, %v691_v34 }
  0x61   :  { %v331_v58 = vpop.permute.xlu2 %330 }
  0x62   :  { %v342_v22 = vsub.f32 %v331_v58, %v505_v11 }
  0x69   :  { %v333_v21 = vpop.permute.xlu2 %332 }
  0x6a   :  { %v343_v15 = vsub.f32 %v333_v21, %v530_v30 }
  0x78   :  { %v133_v48 = vpop.permute.xlu1 %132  ;;  %v129_v49 = vpop.permute.xlu0 %128 }
  0x79   :  { %v136_v50 = vsub.f32 %v129_v49, %v133_v48  ;;  %v140_v54 = vsub.f32 %v129_v49, %v501_v9  ;;  %v144_v57 = vsub.f32 %v501_v9, %v133_v48  ;;  %v308_v48 = vmul.f32 %v306_v12, %v265_v63 }
  0x7a   :  { %v317_v9 = vsel %vm79_vm2, %v315_v47, %v314_v46 }
  0x7b   :  { %v138_v53 = vmul.f32 0.5, %v136_v50 }
  0x7d   :  { %v142_v61 = vsel %vm20_vm5, %v140_v54, %v138_v53 }
  0x7e   :  { %v146_v2 = vsel %vm21_vm6, %v144_v57, %v142_v61 }
  0x7f   :  { %v190_v29 = vmul.f32 0.2, %v146_v2 }
  0x80   :  { %v135_v26 = vpop.permute.xlu1 %134  ;;  %v131_v4 = vpop.permute.xlu0 %130 }
  0x81   :  { %v137_v32 = vsub.f32 %v131_v4, %v135_v26  ;;  %v723_v16 = vsub.f32 %v188_v62, %v190_v29  ;;  %v141_v35 = vsub.f32 %v131_v4, %v503_v10  ;;  %v145_v55 = vsub.f32 %v503_v10, %v135_v26 }
  0x82   :  { %v390_v62 = vmul.f32 %v362_v18, %v308_v48  ;;  %v312_v10 = vsel %vm72_vm1, %v310_v44, %v311_v45 }
  0x83   :  { %v139_v8 = vmul.f32 0.5, %v137_v32  ;;  %198 = vrot.lane.b32.xlu1 %v723_v16, %s469_s19  ;;  %194 = vrot.lane.b32.xlu2 %v723_v16, %s470_s20  ;;  %v322_v46 = vsub.f32 %v312_v10, %v505_v11 }
  0x85   :  { %v143_v14 = vsel %vm20_vm5, %v141_v35, %v139_v8 }
  0x86   :  { %v147_v20 = vsel %vm21_vm6, %v145_v55, %v143_v14 }
  0x87   :  { %v191_v33 = vmul.f32 0.2, %v147_v20  ;;  %v89_v20 = vpop.permute.xlu2 %88 }
  0x88   :  { %v337_v13 = vpop.permute.xlu1 %336  ;;  %v335_v38 = vpop.permute.xlu0 %334 }
  0x89   :  { %v339_v49 = vsub.f32 %v333_v21, %v337_v13  ;;  %v338_v50 = vsub.f32 %v331_v58, %v335_v38  ;;  %v347_v53 = vsub.f32 %v530_v30, %v337_v13  ;;  %v744_v54 = vsub.f32 %v189_v24, %v191_v33  ;;  %v459_v30 = vld [vmem:[%s903_s0 + $0x60] sm:$0xff] }
  0x8a   :  { %v346_v6 = vsub.f32 %v505_v11, %v335_v38  ;;  %v353_v14 = vmul.f32 0.001, %v459_v30 }
  0x8b   :  { %v341_v57 = vmul.f32 0.5, %v339_v49  ;;  %v340_v59 = vmul.f32 0.5, %v338_v50  ;;  %196 = vrot.lane.b32.xlu0 %v744_v54, %s470_s20  ;;  %200 = vrot.lane.b32.xlu2 %v744_v54, %s469_s19 }
  0x8c   :  { %v364_v21 = vmul.f32 %v353_v14, %v308_v48 }
  0x8d   :  { %v345_v60 = vsel %vm20_vm5, %v343_v15, %v341_v57  ;;  %v344_v61 = vsel %vm20_vm5, %v342_v22, %v340_v59  ;;  %v375_v22 = vrot.slane %v693_v52, 7 }
  0x8e   :  { %v349_v58 = vsel %vm21_vm6, %v347_v53, %v345_v60  ;;  %v348_v2 = vsel %vm21_vm6, %v346_v6, %v344_v61  ;;  %v371_v53 = vrot.slane %v693_v52, 1 }
  0x8f   :  { %v393_v3 = vmul.f32 0.2, %v349_v58  ;;  %v392_v29 = vmul.f32 0.2, %v348_v2  ;;  %v836_v6 = vpop.permute.xlu2 %288 }
  0x90   :  { %v87_v13 = vpop.permute.xlu1 %86 }
  0x91   :  { %v761_v26 = vsub.f32 %v390_v62, %v392_v29  ;;  %v763_v4 = vsub.f32 %v391_v1, %v393_v3 }
  0x93   :  { %398 = vrot.lane.b32.xlu1 %v763_v4, %s470_s20  ;;  %396 = vrot.lane.b32.xlu0 %v761_v26, %s470_s20 }
  0x94   :  { %400 = vrot.lane.b32.xlu2 %v761_v26, %s469_s19 }
  0x98   :  { %v95_v62 = vpop.permute.xlu1 %94 }
  0x99   :  { %v97_v30 = vsel %vm26_vm9, %v95_v62, 0.0 }
  0x9b   :  { %294 = vrot.lane.b32.xlu1 %v625_v39, %s470_s20  ;;  %402 = vrot.lane.b32.xlu0 %v763_v4, %s469_s19  ;;  %v115_v39 = vsel %vm79_vm2, %v113_v43, %v112_v42  ;;  %v318_v43 = vsub.f32 %v312_v10, %v317_v9 }
  0x9c   :  { %296 = vrot.lane.b32.xlu2 %v287_v28, %s470_s20 }
  0x9d   :  { %v320_v45 = vmul.f32 0.5, %v318_v43 }
  0x9f   :  { %v324_v56 = vsel %vm16_vm7, %v322_v46, %v320_v45 }
  0xa0   :  { %v366_v24 = vmul.f32 0.2, %v324_v56 }
  0xa2   :  { %v368_v50 = vsub.f32 %v364_v21, %v366_v24 }
  0xa3   :  { %290 = vrot.lane.b32.xlu0 %v287_v28, %s469_s19  ;;  %v116_v28 = vsub.f32 %v110_v27, %v115_v39  ;;  %v93_v27 = vpop.permute.xlu0 %92 }
  0xa4   :  { %v370_v51 = vrot.slane %v368_v50, 1  ;;  %v374_v48 = vrot.slane %v368_v50, 7 }
  0xa5   :  { %v118_v32 = vmul.f32 0.5, %v116_v28 }
  0xa6   :  { %v372_v57 = vsel %vm72_vm1, %v370_v51, %v371_v53  ;;  %v377_v59 = vsel %vm79_vm2, %v375_v22, %v374_v48  ;;  %v373_v58 = vsel %vm72_vm1, %v371_v53, %v370_v51  ;;  %v376_v2 = vsel %vm79_vm2, %v374_v48, %v375_v22 }
  0xa7   :  { %v122_v7 = vsel %vm16_vm7, %v120_v17, %v118_v32  ;;  %v378_v60 = vsub.f32 %v372_v57, %v377_v59  ;;  %v382_v61 = vsub.f32 %v372_v57, %v368_v50  ;;  %v379_v3 = vsub.f32 %v373_v58, %v376_v2 }
  0xa8   :  { %v164_v8 = vmul.f32 0.2, %v122_v7  ;;  %v387_v25 = vsub.f32 %v693_v52, %v376_v2 }
  0xa9   :  { %v381_v37 = vmul.f32 0.5, %v379_v3 }
  0xaa   :  { %v166_v42 = vsub.f32 %v162_v5, %v164_v8 }
  0xab   :  { %v389_v39 = vsel %vm19_vm4, %v387_v25, %v381_v37 }
  0xac   :  { %v168_v34 = vrot.slane %v166_v42, 1  ;;  %v172_v35 = vrot.slane %v166_v42, 7 }
  0xae   :  { %v170_v55 = vsel %vm72_vm1, %v168_v34, %v169_v40  ;;  %v175_v44 = vsel %vm79_vm2, %v173_v41, %v172_v35  ;;  %v171_v33 = vsel %vm72_vm1, %v169_v40, %v168_v34  ;;  %v174_v15 = vsel %vm79_vm2, %v172_v35, %v173_v41 }
  0xaf   :  { %v176_v47 = vsub.f32 %v170_v55, %v175_v44  ;;  %v180_v63 = vsub.f32 %v170_v55, %v166_v42  ;;  %v177_v11 = vsub.f32 %v171_v33, %v174_v15  ;;  %v185_v49 = vsub.f32 %v680_v23, %v174_v15 }
  0xb0   :  { %v380_v23 = vmul.f32 0.5, %v378_v60  ;;  %v90_v40 = vsel %vm27_vm8, %v87_v13, 0.0  ;;  %v91_v44 = vsel %vm27_vm8, %v89_v20, 0.0 }
  0xb1   :  { %v178_v12 = vmul.f32 0.5, %v176_v47  ;;  %v179_v38 = vmul.f32 0.5, %v177_v11 }
  0xb2   :  { %v384_v1 = vsel %vm16_vm7, %v382_v61, %v380_v23 }
  0xb3   :  { %v182_v0 = vsel %vm16_vm7, %v180_v63, %v178_v12  ;;  %v187_v18 = vsel %vm19_vm4, %v185_v49, %v179_v38 }
  0xdd   :  { %v195_v29 = vpop.permute.xlu2 %194 }
  0xde   :  { %v206_v17 = vsub.f32 %v195_v29, %v723_v16 }
  0xe5   :  { %v201_v10 = vpop.permute.xlu2 %200 }
  0xe6   :  { %v211_v34 = vsub.f32 %v744_v54, %v201_v10 }
  0xee   :  { %v401_v12 = vpop.permute.xlu2 %400 }
  0xef   :  { %v412_v15 = vsub.f32 %v761_v26, %v401_v12 }
  0xf5   :  { %v199_v28 = vpop.permute.xlu1 %198 }
  0xf6   :  { %v202_v32 = vsub.f32 %v195_v29, %v199_v28  ;;  %v210_v7 = vsub.f32 %v723_v16, %v199_v28  ;;  %v96_v16 = vsel %vm26_vm9, %v93_v27, 0.0  ;;  %v297_v58 = vpop.permute.xlu2 %296 }
  0xf7   :  { %v98_v35 = vsub.f32 %v90_v40, %v96_v16  ;;  %v299_v29 = vsel %vm26_vm9, %v297_v58, 0.0 }
  0xf8   :  { %v204_v5 = vmul.f32 0.5, %v202_v32 }
  0xfa   :  { %v208_v31 = vsel %vm20_vm5, %v206_v17, %v204_v5 }
  0xfb   :  { %v212_v8 = vsel %vm21_vm6, %v210_v7, %v208_v31 }
  0xfc   :  { %v214_v9 = vadd.f32 %v212_v8, %v182_v0 }
  0xfd   :  { %v197_v52 = vpop.permute.xlu0 %196 }
  0xfe   :  { %v203_v36 = vsub.f32 %v197_v52, %v201_v10  ;;  %v207_v42 = vsub.f32 %v197_v52, %v744_v54  ;;  %v216_v43 = vmul.f32 0.2, %v214_v9  ;;  %v99_v54 = vsub.f32 %v91_v44, %v97_v30 }
 0x100   :  { %v205_v41 = vmul.f32 0.5, %v203_v36  ;;  %v218_v63 = vsub.f32 %v216_v43, %v98_v35 }
 0x102   :  { %v209_v55 = vsel %vm20_vm5, %v207_v42, %v205_v41  ;;  %v220_v33 = vsel %vm30_vm10, %v218_v63, 0.0 }
 0x103   :  { %v213_v45 = vsel %vm21_vm6, %v211_v34, %v209_v55  ;;  %v222_v49 = vmul.f32 %v220_v33, %v220_v33 }
 0x104   :  { %v215_v47 = vadd.f32 %v213_v45, %v187_v18 }
 0x105   :  { %v399_v46 = vpop.permute.xlu1 %398  ;;  %v397_v14 = vpop.permute.xlu0 %396 }
 0x106   :  { %v404_v56 = vsub.f32 %v397_v14, %v401_v12  ;;  %v217_v0 = vmul.f32 0.2, %v215_v47  ;;  %v408_v24 = vsub.f32 %v397_v14, %v761_v26  ;;  %v292_v26 = vsel %vm27_vm8, %v836_v6, 0.0 }
 0x107   :  { %v409_v59 = vsub.f32 %v399_v46, %v763_v4 }
 0x108   :  { %v406_v21 = vmul.f32 0.5, %v404_v56  ;;  %v219_v20 = vsub.f32 %v217_v0, %v99_v54 }
 0x10a   :  { %v410_v11 = vsel %vm20_vm5, %v408_v24, %v406_v21  ;;  %v221_v13 = vsel %vm30_vm10, %v219_v20, 0.0 }
 0x10b   :  { %v414_v38 = vsel %vm21_vm6, %v412_v15, %v410_v11  ;;  %v223_v50 = vmul.f32 %v221_v13, %v221_v13 }
 0x10c   :  { %v416_v53 = vadd.f32 %v414_v38, %v384_v1 }
 0x10d   :  { %v295_v18 = vpop.permute.xlu1 %294  ;;  %v403_v51 = vpop.permute.xlu0 %402  ;;  %v224_v48 = vadd.f32 %v223_v50, %v222_v49 }
 0x10e   :  { %v405_v22 = vsub.f32 %v399_v46, %v403_v51  ;;  %v298_v57 = vsel %vm26_vm9, %v295_v18, 0.0  ;;  %v413_v23 = vsub.f32 %v763_v4, %v403_v51  ;;  %v418_v62 = vmul.f32 0.2, %v416_v53 }
 0x10f   :  { %225 = vadd.xlane.f32.xlu0 %v224_v48  ;;  %v300_v61 = vsub.f32 %v292_v26, %v298_v57 }
 0x110   :  { %v407_v60 = vmul.f32 0.5, %v405_v22 }
 0x111   :  { %v420_v37 = vsub.f32 %v418_v62, %v300_v61 }
 0x112   :  { %v411_v1 = vsel %vm20_vm5, %v409_v59, %v407_v60 }
 0x113   :  { %v415_v2 = vsel %vm21_vm6, %v413_v23, %v411_v1  ;;  %v422_v32 = vsel %vm30_vm10, %v420_v37, 0.0 }
 0x114   :  { %v417_v3 = vadd.f32 %v415_v2, %v389_v39  ;;  %v424_v5 = vmul.f32 %v422_v32, %v422_v32 }
 0x115   :  { %v291_v6 = vpop.permute.xlu0 %290 }
 0x116   :  { %v293_v25 = vsel %vm27_vm8, %v291_v6, 0.0  ;;  %v419_v27 = vmul.f32 0.2, %v417_v3 }
 0x117   :  { %v301_v4 = vsub.f32 %v293_v25, %v299_v29 }
 0x119   :  { %v421_v28 = vsub.f32 %v419_v27, %v301_v4 }
 0x11b   :  { %v423_v17 = vsel %vm30_vm10, %v421_v28, 0.0 }
 0x11c   :  { %v425_v7 = vmul.f32 %v423_v17, %v423_v17 }
 0x11e   :  { %v426_v39 = vadd.f32 %v425_v7, %v424_v5 }
 0x120   :  { %427 = vadd.xlane.f32.xlu1 %v426_v39 }
 0x182   :  { %v226_v31 = vpop.xlane.xlu0 %225 }
 0x183   :  { %v227_v8 = vrot.slane %v226_v31, 4 }
 0x185   :  { %v228_v10 = vadd.f32 %v227_v8, %v226_v31 }
 0x187   :  { %v229_v9 = vrot.slane %v228_v10, 2 }
 0x189   :  { %v230_v52 = vadd.f32 %v229_v9, %v228_v10 }
 0x18b   :  { %v231_v36 = vrot.slane %v230_v52, 1 }
 0x18d   :  { %v232_v40 = vadd.f32 %v231_v36, %v230_v52 }
 0x18f   :  { %463 = vpush %v232_v40 }
 0x193   :  { %v428_v16 = vpop.xlane.xlu1 %427 }
 0x194   :  { %v429_v41 = vrot.slane %v428_v16, 4 }
 0x196   :  { %v430_v42 = vadd.f32 %v429_v41, %v428_v16 }
 0x198   :  { %v431_v43 = vrot.slane %v430_v42, 2 }
 0x19a   :  { %v432_v34 = vadd.f32 %v431_v43, %v430_v42 }
 0x19c   :  { %v433_v35 = vrot.slane %v432_v34, 1 }
 0x19e   :  { %v434_v19 = vadd.f32 %v433_v35, %v432_v34 }
 0x1a0   :  { %465 = vpush %v434_v19 }
 0x1c0   :  { %s464_s0 = spop %463 }
 0x1d1   :  { %s466_s22 = spop %465 }
 0x1d2   :  { %s436_s1 = sadd.f32 %s466_s22, %s464_s0 }
 0x1d4   :  { %v437_v55 = vstv %s436_s1 }
 0x1d5   :  { %438 = vst [vmem:[%s904_s2] sm:$0xff] %v437_v55 }

</bundles_post_ra>
